<compile_context>
chip_gen: v6e
topology: v6e:2x2x1
jax: 0.10.0
libtpu: 0.0.40
codegen_flags: <defaults>
</compile_context>

<pallas_src>
import functools

import jax
import jax.numpy as jnp
from jax.experimental import pallas as pl
from jax.experimental.pallas import tpu as pltpu

LANE = 128
SUBLANE = 8


def _round_up(x, m):
    return (x + m - 1) // m * m


def _cdiv(a, b):
    return -(-a // b)


def _chip_info():
    """Best-effort chip class + physical VMEM capacity (bytes)."""
    kind = ""
    try:
        kind = jax.devices()[0].device_kind.lower()
    except Exception:
        pass
    is_v5_class = ("v5" in kind) or ("v4" in kind) or ("v3" in kind)
    is_v7 = "v7" in kind
    vmem = None
    try:
        vmem = int(pltpu.get_tpu_info().vmem_capacity_bytes)
    except Exception:
        vmem = None
    if vmem is None:
        if is_v7:
            vmem = 64 << 20
        elif ("v5" in kind) or ("v6" in kind):
            vmem = 128 << 20
        else:
            vmem = 64 << 20  # conservative default
    return kind, is_v5_class, is_v7, vmem


def _pad_feature_dim(d, use_256):
    # v6e/v7x MXU is 2x256x256 -> prefer 256-aligned K/N once dims are large.
    if use_256 and d >= 128:
        return _round_up(d, 256)
    return _round_up(d, LANE)


def _apply_activation(h, activation):
    if activation == "relu":
        return jnp.maximum(h, 0.0)
    if activation == "sigmoid":
        return jax.nn.sigmoid(h)
    if activation == "tanh":
        return jnp.tanh(h)
    return h  # unknown activation string -> identity (matches the PyTorch code)


def _mlp_kernel(*refs, num_layers, activation, bf16_act):
    # refs = (x_ref, w0_ref, b0_ref, w1_ref, b1_ref, ..., out_ref)
    x_ref = refs[0]
    out_ref = refs[-1]

    h = x_ref[...]                                       # (TB, in_pad) bf16
    for i in range(num_layers):
        w = refs[1 + 2 * i][...]                         # (K_pad, N_pad) bf16
        b = refs[2 + 2 * i][...]                         # (1, N_pad)    f32
        # bf16 MXU inputs, f32 accumulation
        acc = jnp.dot(h.astype(jnp.bfloat16), w,
                      preferred_element_type=jnp.float32) + b
        if i < num_layers - 1:                           # only between hidden layers
            if bf16_act:                                 # v6e/v7x: bf16 VPU/EUP
                h = _apply_activation(acc.astype(jnp.bfloat16), activation)
            else:                                        # v5e: no bf16 VALU/EUP
                h = _apply_activation(acc, activation)
        else:
            h = acc
    out_ref[...] = h.astype(out_ref.dtype)               # lane-dense store


def prepare_params(params, input_size, *, use_256_align=None):
    """Pad + cast parameters ONCE (hoisted out of the per-call hot path).

    params: list of (W_t, b) per layer, W_t shaped (in, out) == torch W.T.
    Zero-padded weight rows neutralize garbage from padded input columns,
    so padding is activation-safe (incl. sigmoid(0)=0.5 on padded lanes).
    """
    if use_256_align is None:
        _, is_v5, _, _ = _chip_info()
        use_256_align = not is_v5

    dims = [input_size] + [w.shape[1] for w, _ in params]
    pdims = [_pad_feature_dim(d, use_256_align) for d in dims]

    flat = []
    for i, (w, b) in enumerate(params):
        w_p = jnp.zeros((pdims[i], pdims[i + 1]), jnp.bfloat16)
        w_p = w_p.at[: w.shape[0], : w.shape[1]].set(w.astype(jnp.bfloat16))
        b_row = jnp.reshape(b, (1, -1)).astype(jnp.float32)
        b_p = jnp.zeros((1, pdims[i + 1]), jnp.float32)
        b_p = b_p.at[:, : b_row.shape[1]].set(b_row)
        flat += [w_p, b_p]

    return {
        "flat": tuple(flat),
        "dims": tuple(dims),
        "pdims": tuple(pdims),
        "num_layers": len(params),
    }


def deep_ann_forward(x, prepared, activation="relu", max_block_batch=2048):
    """Fused forward pass of DeepANN using prepared (padded, bf16) params."""
    _, is_v5, is_v7, vmem_cap = _chip_info()

    flat = prepared["flat"]
    dims = prepared["dims"]
    pdims = prepared["pdims"]
    num_layers = prepared["num_layers"]

    batch, in_dim = x.shape
    assert in_dim == dims[0], "input feature dim mismatch"
    out_dim = dims[-1]

    out_dtype = x.dtype
    out_itemsize = jnp.dtype(out_dtype).itemsize

    # --- VMEM economics ------------------------------------------------------
    # Resident params (single-buffered via pl.Buffered(1)).
    param_bytes = sum(int(a.size) * a.dtype.itemsize for a in flat)
    vmem_budget = int(vmem_cap * 0.85)                     # leave headroom

    x_buffers = 3 if is_v5 else 2                          # v5e: hide low HBM BW
    # Per-row streamed bytes: bf16 x tile (x_buffers) + out tile (double-buffered).
    stream_per_row = x_buffers * pdims[0] * 2 + 2 * pdims[-1] * out_itemsize
    # Live activation slab in one layer: f32 h (4K) + bf16 copy (2K) + f32 acc (4N).
    live_per_row = max(6 * pdims[i] + 4 * pdims[i + 1] for i in range(num_layers))

    avail = vmem_budget - param_bytes
    # TODO(synk): weight-streaming (per-layer N-tiled / emit_pipeline) fallback for
    # models whose bf16 params do not fit resident in VMEM (esp. v7x's 64 MiB/TC).
    if avail <= 0:
        tb = SUBLANE
    else:
        tb = max(SUBLANE, int(avail // (stream_per_row + live_per_row)))

    batch_r = _round_up(batch, SUBLANE)
    tb = max(SUBLANE, min(tb, batch_r, max_block_batch))
    # Minimize padding waste: smallest tile giving the same grid count.
    grid_n = _cdiv(batch_r, tb)
    tb = _cdiv(batch_r, grid_n)
    granule = 256 if (not is_v5 and tb >= 256) else SUBLANE
    tb = _round_up(tb, granule)
    # v7x: make sure both TensorCores get a grid step to work on.
    if is_v7 and _cdiv(batch_r, tb) < 2 and batch_r > SUBLANE:
        tb = _round_up(_cdiv(batch_r, 2), SUBLANE)
    b_pad = _round_up(batch_r, tb)
    grid = (b_pad // tb,)

    # --- x streamed in bf16 (fast path when already aligned) -----------------
    if (batch != b_pad) or (in_dim != pdims[0]) or (x.dtype != jnp.bfloat16):
        x_p = jnp.zeros((b_pad, pdims[0]), jnp.bfloat16)
        x_p = x_p.at[:batch, :in_dim].set(x.astype(jnp.bfloat16))
    else:
        x_p = x

    # --- BlockSpecs: batch-tiled x/out; resident single-buffered params ------
    in_specs = [pl.BlockSpec((tb, pdims[0]), lambda i: (i, 0),
                             pipeline_mode=pl.Buffered(x_buffers))]
    for li in range(num_layers):
        in_specs.append(pl.BlockSpec((pdims[li], pdims[li + 1]),
                                     lambda i: (0, 0),
                                     pipeline_mode=pl.Buffered(1)))
        in_specs.append(pl.BlockSpec((1, pdims[li + 1]),
                                     lambda i: (0, 0),
                                     pipeline_mode=pl.Buffered(1)))
    out_spec = pl.BlockSpec((tb, pdims[-1]), lambda i: (i, 0))

    # --- VMEM limit + cost estimate ------------------------------------------
    needed = (param_bytes
              + x_buffers * tb * pdims[0] * 2
              + 2 * tb * pdims[-1] * out_itemsize
              + tb * live_per_row)
    vmem_limit = int(max(32 << 20, min(vmem_budget, int(needed * 1.25))))

    flops = 2 * b_pad * sum(pdims[i] * pdims[i + 1] for i in range(num_layers))
    transcendentals = (b_pad * sum(pdims[1:-1])
                       if activation in ("sigmoid", "tanh") else 0)
    bytes_accessed = (b_pad * pdims[0] * 2 + param_bytes
                      + b_pad * pdims[-1] * out_itemsize)

    kernel = functools.partial(_mlp_kernel, num_layers=num_layers,
                               activation=activation, bf16_act=not is_v5)
    out_p = pl.pallas_call(
        kernel,
        out_shape=jax.ShapeDtypeStruct((b_pad, pdims[-1]), out_dtype),
        grid=grid,
        in_specs=in_specs,
        out_specs=out_spec,
        compiler_params=pltpu.CompilerParams(
            dimension_semantics=("parallel",),    # v7x: shard batch across TCs
            vmem_limit_bytes=vmem_limit),
        cost_estimate=pl.CostEstimate(flops=int(flops),
                                      transcendentals=int(transcendentals),
                                      bytes_accessed=int(bytes_accessed)),
    )(x_p, *flat)

    if batch == b_pad and out_dim == pdims[-1]:
        return out_p
    return out_p[:batch, :out_dim]


def deep_ann_forward_raw(x, params, activation="relu"):
    """Convenience one-shot wrapper (prepares params on the fly)."""
    prepared = prepare_params(params, x.shape[1])
    return deep_ann_forward(x, prepared, activation=activation)


def init_params(key, layer_sizes):
    """Deterministic init mirroring nn.Linear's U(-1/sqrt(fan_in), 1/sqrt(fan_in))."""
    params = []
    for i in range(len(layer_sizes) - 1):
        fan_in, fan_out = layer_sizes[i], layer_sizes[i + 1]
        key, wk, bk = jax.random.split(key, 3)
        bound = 1.0 / float(fan_in) ** 0.5
        # stored pre-transposed: (in, out) == torch W.T
        w_t = jax.random.uniform(wk, (fan_in, fan_out), jnp.float32, -bound, bound)
        b = jax.random.uniform(bk, (1, fan_out), jnp.float32, -bound, bound)
        params.append((w_t, b))
    return params


if __name__ == "__main__":
    # DeepANN(input_size=16, hidden_layer_sizes=[32, 32], output_size=4,
    #         activation_func='relu')
    input_size = 16
    hidden_layer_sizes = [32, 32]
    output_size = 4
    activation = "relu"
    batch = 8

    key = jax.random.PRNGKey(0)
    key, xk = jax.random.split(key)
    x = jax.random.normal(xk, (batch, input_size), dtype=jnp.float32)

    layer_sizes = [input_size] + hidden_layer_sizes + [output_size]
    params = init_params(key, layer_sizes)

    prepared = prepare_params(params, input_size)   # pad/cast once, out of hot path
    out = deep_ann_forward(x, prepared, activation=activation)
    out = jax.block_until_ready(out)

    # Reference mirroring the kernel's math (bf16 MXU inputs, f32 accumulate).
    h = x
    for i, (w, b) in enumerate(params):
        h = jnp.dot(h.astype(jnp.bfloat16), w.astype(jnp.bfloat16),
                    preferred_element_type=jnp.float32) + jnp.reshape(b, (1, -1))
        if i < len(params) - 1:
            h = jnp.maximum(h, 0.0)

    # Full-f32 reference as an additional sanity bound (loose, bf16 rounding).
    h32 = x
    for i, (w, b) in enumerate(params):
        h32 = h32 @ w + jnp.reshape(b, (1, -1))
        if i < len(params) - 1:
            h32 = jnp.maximum(h32, 0.0)

    assert out.shape == (batch, output_size)
    assert jnp.allclose(out, h, atol=2e-2, rtol=2e-2)
    assert jnp.allclose(out, h32, atol=1e-1, rtol=1e-1)

    print("KERNEL_OK")
</pallas_src>

<mosaic_0001>
module attributes {stable_mosaic.version = 11 : i64} {
  func.func @_mlp_kernel(%arg0: i32, %arg1: memref<8x128xbf16, #tpu.memory_space<vmem>>, %arg2: memref<128x128xbf16, #tpu.memory_space<vmem>>, %arg3: memref<1x128xf32, #tpu.memory_space<vmem>>, %arg4: memref<128x128xbf16, #tpu.memory_space<vmem>>, %arg5: memref<1x128xf32, #tpu.memory_space<vmem>>, %arg6: memref<128x128xbf16, #tpu.memory_space<vmem>>, %arg7: memref<1x128xf32, #tpu.memory_space<vmem>>, %arg8: memref<8x128xf32, #tpu.memory_space<vmem>>) attributes {dimension_semantics = [#tpu.dimension_semantics<parallel>], iteration_bounds = array<i64: 1>, scalar_prefetch = 0 : i64, scratch_operands = 0 : i64, tpu.core_type = #tpu.core_type<tc>, window_params = [{pipeline_mode = #tpu.pipeline_mode<double_buffered>, transform_indices = @transform_0, window_bounds = array<i64: 8, 128>}, {pipeline_mode = #tpu.pipeline_mode<synchronous>, transform_indices = @transform_1, window_bounds = array<i64: 128, 128>}, {pipeline_mode = #tpu.pipeline_mode<synchronous>, transform_indices = @transform_2, window_bounds = array<i64: 1, 128>}, {pipeline_mode = #tpu.pipeline_mode<synchronous>, transform_indices = @transform_3, window_bounds = array<i64: 128, 128>}, {pipeline_mode = #tpu.pipeline_mode<synchronous>, transform_indices = @transform_4, window_bounds = array<i64: 1, 128>}, {pipeline_mode = #tpu.pipeline_mode<synchronous>, transform_indices = @transform_5, window_bounds = array<i64: 128, 128>}, {pipeline_mode = #tpu.pipeline_mode<synchronous>, transform_indices = @transform_6, window_bounds = array<i64: 1, 128>}, {transform_indices = @transform_7, window_bounds = array<i64: 8, 128>}]} {
    %c0 = arith.constant 0 : index
    %c0_0 = arith.constant 0 : index
    %0 = vector.load %arg1[%c0, %c0_0] : memref<8x128xbf16, #tpu.memory_space<vmem>>, vector<8x128xbf16>
    %c0_1 = arith.constant 0 : index
    %c0_2 = arith.constant 0 : index
    %1 = vector.load %arg2[%c0_1, %c0_2] : memref<128x128xbf16, #tpu.memory_space<vmem>>, vector<128x128xbf16>
    %c0_3 = arith.constant 0 : index
    %c0_4 = arith.constant 0 : index
    %2 = vector.load %arg3[%c0_3, %c0_4] : memref<1x128xf32, #tpu.memory_space<vmem>>, vector<1x128xf32>
    %cst = arith.constant dense<0.000000e+00> : vector<8x128xf32>
    %3 = tpu.matmul %0, %1, %cst {dimension_numbers = #tpu.dot_dimension_numbers<[1], [0], [0], [1], [0, 0, 1, 1], [], []>} : vector<8x128xbf16>, vector<128x128xbf16>, vector<8x128xf32> -> vector<8x128xf32>
    %4 = vector.broadcast %2 : vector<1x128xf32> to vector<8x128xf32>
    %5 = arith.addf %3, %4 : vector<8x128xf32>
    %6 = arith.truncf %5 : vector<8x128xf32> to vector<8x128xbf16>
    %cst_5 = arith.constant 0.000000e+00 : bf16
    %7 = vector.broadcast %cst_5 : bf16 to vector<8x128xbf16>
    %8 = arith.maximumf %6, %7 : vector<8x128xbf16>
    %c0_6 = arith.constant 0 : index
    %c0_7 = arith.constant 0 : index
    %9 = vector.load %arg4[%c0_6, %c0_7] : memref<128x128xbf16, #tpu.memory_space<vmem>>, vector<128x128xbf16>
    %c0_8 = arith.constant 0 : index
    %c0_9 = arith.constant 0 : index
    %10 = vector.load %arg5[%c0_8, %c0_9] : memref<1x128xf32, #tpu.memory_space<vmem>>, vector<1x128xf32>
    %cst_10 = arith.constant dense<0.000000e+00> : vector<8x128xf32>
    %11 = tpu.matmul %8, %9, %cst_10 {dimension_numbers = #tpu.dot_dimension_numbers<[1], [0], [0], [1], [0, 0, 1, 1], [], []>} : vector<8x128xbf16>, vector<128x128xbf16>, vector<8x128xf32> -> vector<8x128xf32>
    %12 = vector.broadcast %10 : vector<1x128xf32> to vector<8x128xf32>
    %13 = arith.addf %11, %12 : vector<8x128xf32>
    %14 = arith.truncf %13 : vector<8x128xf32> to vector<8x128xbf16>
    %cst_11 = arith.constant 0.000000e+00 : bf16
    %15 = vector.broadcast %cst_11 : bf16 to vector<8x128xbf16>
    %16 = arith.maximumf %14, %15 : vector<8x128xbf16>
    %c0_12 = arith.constant 0 : index
    %c0_13 = arith.constant 0 : index
    %17 = vector.load %arg6[%c0_12, %c0_13] : memref<128x128xbf16, #tpu.memory_space<vmem>>, vector<128x128xbf16>
    %c0_14 = arith.constant 0 : index
    %c0_15 = arith.constant 0 : index
    %18 = vector.load %arg7[%c0_14, %c0_15] : memref<1x128xf32, #tpu.memory_space<vmem>>, vector<1x128xf32>
    %cst_16 = arith.constant dense<0.000000e+00> : vector<8x128xf32>
    %19 = tpu.matmul %16, %17, %cst_16 {dimension_numbers = #tpu.dot_dimension_numbers<[1], [0], [0], [1], [0, 0, 1, 1], [], []>} : vector<8x128xbf16>, vector<128x128xbf16>, vector<8x128xf32> -> vector<8x128xf32>
    %20 = vector.broadcast %18 : vector<1x128xf32> to vector<8x128xf32>
    %21 = arith.addf %19, %20 : vector<8x128xf32>
    %c0_17 = arith.constant 0 : index
    %c0_18 = arith.constant 0 : index
    %22 = vector.load %arg8[%c0_17, %c0_18] : memref<8x128xf32, #tpu.memory_space<vmem>>, vector<8x128xf32>
    tpu.vector_store %arg8[%c0_17, %c0_18], %21 {strides = array<i32>} : memref<8x128xf32, #tpu.memory_space<vmem>>, vector<8x128xf32>,
    return
  }
  func.func @transform_0(%arg0: i32) -> (i32, i32) {
    %c0_i32 = arith.constant 0 : i32
    %c0_i32_0 = arith.constant 0 : i32
    return %arg0, %c0_i32 : i32, i32
  }
  func.func @transform_1(%arg0: i32) -> (i32, i32) {
    %c0_i32 = arith.constant 0 : i32
    %c0_i32_0 = arith.constant 0 : i32
    %c0_i32_1 = arith.constant 0 : i32
    return %c0_i32, %c0_i32_0 : i32, i32
  }
  func.func @transform_2(%arg0: i32) -> (i32, i32) {
    %c0_i32 = arith.constant 0 : i32
    %c0_i32_0 = arith.constant 0 : i32
    %c0_i32_1 = arith.constant 0 : i32
    return %c0_i32, %c0_i32_0 : i32, i32
  }
  func.func @transform_3(%arg0: i32) -> (i32, i32) {
    %c0_i32 = arith.constant 0 : i32
    %c0_i32_0 = arith.constant 0 : i32
    %c0_i32_1 = arith.constant 0 : i32
    return %c0_i32, %c0_i32_0 : i32, i32
  }
  func.func @transform_4(%arg0: i32) -> (i32, i32) {
    %c0_i32 = arith.constant 0 : i32
    %c0_i32_0 = arith.constant 0 : i32
    %c0_i32_1 = arith.constant 0 : i32
    return %c0_i32, %c0_i32_0 : i32, i32
  }
  func.func @transform_5(%arg0: i32) -> (i32, i32) {
    %c0_i32 = arith.constant 0 : i32
    %c0_i32_0 = arith.constant 0 : i32
    %c0_i32_1 = arith.constant 0 : i32
    return %c0_i32, %c0_i32_0 : i32, i32
  }
  func.func @transform_6(%arg0: i32) -> (i32, i32) {
    %c0_i32 = arith.constant 0 : i32
    %c0_i32_0 = arith.constant 0 : i32
    %c0_i32_1 = arith.constant 0 : i32
    return %c0_i32, %c0_i32_0 : i32, i32
  }
  func.func @transform_7(%arg0: i32) -> (i32, i32) {
    %c0_i32 = arith.constant 0 : i32
    %c0_i32_0 = arith.constant 0 : i32
    return %arg0, %c0_i32 : i32, i32
  }
}

</mosaic_0001>

<bundles_post_ra>
// kernel: tpu_custom_call.1
= control target key start
LH: loop header
LB: loop body
LE: loop exit
PB: predicated region body
PF: predicated region fallthrough
CT: control target
= control target key end

     0   :  { %12 = vsyncpa [#allocation3], 0  ;;  %s806_s0 = inlined_call_operand.hbm [shape: bf16[8,128], index: 0, kind: input, shape index: {}]   ;;  %s807_s1 = inlined_call_operand.hbm [shape: bf16[128,128], index: 1, kind: input, shape index: {}]   ;;  %s808_s2 = inlined_call_operand.vmem [shape: f32[1,128], index: 2, kind: input, shape index: {}]   ;;  %s809_s3 = inlined_call_operand.hbm [shape: bf16[128,128], index: 3, kind: input, shape index: {}]   ;;  %s810_s4 = inlined_call_operand.vmem [shape: f32[1,128], index: 4, kind: input, shape index: {}]   ;;  %s811_s5 = inlined_call_operand.hbm [shape: bf16[128,128], index: 5, kind: input, shape index: {}]   ;;  %s812_s6 = inlined_call_operand.vmem [shape: f32[1,128], index: 6, kind: input, shape index: {}]   ;;  %s813_s7 = inlined_call_operand.hbm [shape: f32[8,128], index: 7, kind: output, shape index: {}]  }
   0x1   :  { %13 = vsyncpa [#allocation6], 0 }
   0x2   :  { %14 = vsyncpa [#allocation9], 0 }
   0x3   :  { %15 = vsyncpa [#allocation4], 0  ;;  %s693_s24 = smov [#allocation5]  }
   0x4   :  { %s31_s25 = sshll.u32 %s693_s24, 4  ;;  %s32_s25 = int_to_ptr.vmem [resolvable:$true] %s31_s25 }
   0x5   :  { %s593_s26 = scalar_lea.vmem %s32_s25, 1024  ;;  %p598_p1 = scmp.lt.s32.totalorder %s32_s25, %s32_s25 }
   0x6   :  { %p594_p0 = scmp.ne.s32.totalorder %s32_s25, %s593_s26  ;;  %p599_p2 = scmp.lt.s32.totalorder %s593_s26, %s593_s26 }
   0x8   :  { %p600_p3 = por %p599_p2, %p598_p1 }
   0xa   :  { %p601_p4 = pnand %p600_p3, %p594_p0 }
   0xc   :  { %604 = shalt.err (!%p601_p4)
}
   0xd   :  { %s694_s27 = smov 64   ;;  %s695_s28 = smov 4  }
   0xe   :  { %37 = dma.hbm_to_vmem [thread:$0]  %s807_s1, 1024, %s32_s25, [#allocation6], %s694_s27, %s694_s27, %s695_s28  }
   0xf   :  { %s696_s8 = smov [#allocation2]   ;;  %s697_s10 = smov [#allocation7]  }
  0x10   :  { %s22_s9 = sshll.u32 %s696_s8, 4  ;;  %s45_s11 = sshll.u32 %s697_s10, 4  ;;  %s23_s9 = int_to_ptr.vmem [resolvable:$true] %s22_s9  ;;  %s46_s11 = int_to_ptr.vmem [resolvable:$true] %s45_s11 }
  0x11   :  { %s613_s12 = scalar_lea.vmem %s23_s9, 64  ;;  %p618_p6 = scmp.lt.s32.totalorder %s23_s9, %s23_s9 }
  0x12   :  { %p614_p5 = scmp.ne.s32.totalorder %s23_s9, %s613_s12  ;;  %p619_p7 = scmp.lt.s32.totalorder %s613_s12, %s613_s12 }
  0x14   :  { %p620_p8 = por %p619_p7, %p618_p6 }
  0x16   :  { %p621_p9 = pnand %p620_p8, %p614_p5 }
  0x18   :  { %624 = shalt.err (!%p621_p9)
}
  0x19   :  { %25 = dma.hbm_to_vmem [thread:$0]  %s806_s0, 64, %s23_s9, [#allocation3]  }
  0x1a   :  { %s633_s15 = scalar_lea.vmem %s46_s11, 1024  ;;  %p638_p11 = scmp.lt.s32.totalorder %s46_s11, %s46_s11 }
  0x1b   :  { %p634_p10 = scmp.ne.s32.totalorder %s46_s11, %s633_s15  ;;  %p639_p12 = scmp.lt.s32.totalorder %s633_s15, %s633_s15 }
  0x1d   :  { %p640_p13 = por %p639_p12, %p638_p11 }
  0x1f   :  { %p641_p0 = pnand %p640_p13, %p634_p10 }
  0x21   :  { %644 = shalt.err (!%p641_p0)
}
  0x22   :  { %51 = dma.hbm_to_vmem [thread:$0]  %s809_s3, 1024, %s46_s11, [#allocation6], %s694_s27, %s694_s27, %s695_s28  }
  0x23   :  { %s698_s17 = smov [#allocation8]  }
  0x24   :  { %s59_s18 = sshll.u32 %s698_s17, 4  ;;  %s60_s18 = int_to_ptr.vmem [resolvable:$true] %s59_s18 }
  0x25   :  { %s653_s19 = scalar_lea.vmem %s60_s18, 1024  ;;  %p658_p2 = scmp.lt.s32.totalorder %s60_s18, %s60_s18 }
  0x26   :  { %p654_p1 = scmp.ne.s32.totalorder %s60_s18, %s653_s19  ;;  %p659_p3 = scmp.lt.s32.totalorder %s653_s19, %s653_s19 }
  0x28   :  { %p660_p4 = por %p659_p3, %p658_p2 }
  0x2a   :  { %p661_p5 = pnand %p660_p4, %p654_p1 }
  0x2c   :  { %664 = shalt.err (!%p661_p5)
}
  0x2d   :  { %65 = dma.hbm_to_vmem [thread:$0]  %s811_s5, 1024, %s60_s18, [#allocation9], %s694_s27, %s694_s27, %s695_s28  }
  0x2e   :  { %685 = dma.done.wait [#allocation3], 64  }
  0x2f   :  { %686 = vsyncadd [#allocation3], 4294967232 }
  0x30   :  { %687 = dma.done.wait [#allocation6], 2048  }
  0x31   :  { %688 = vsyncadd [#allocation6], 4294965248 }
  0x32   :  { %689 = dma.done.wait [#allocation9], 1024  }
  0x33   :  { %690 = vsyncadd [#allocation9], 4294966272  ;;  %v699_v0 = vmov 0.0   ;;  %vm700_vm0 = vmmov 0   ;;  %v561_v1 = vld [vmem:[#allocation5 + $0x38] sm:$0xff]   ;;  %v562_v2 = vld [vmem:[#allocation5 + $0x30] sm:$0xff]  }
  0x34   :  { %491 = vmatprep.subr.bf16.mxu0 %v699_v0  ;;  %507 = vmatprep.mubr.msk.bf16.mxu0 %vm700_vm0, %v699_v0  ;;  %v563_v3 = vld [vmem:[#allocation5 + $0x28] sm:$0xff]   ;;  %v569_v4 = vld [vmem:[#allocation7 + $0x38] sm:$0xff]   ;;  %v564_v5 = vld [vmem:[#allocation5 + $0x20] sm:$0xff]   ;;  %v701_v30 = vmov 0   ;;  %s702_s24 = smov [#allocation10]  }
  0x35   :  { %511 = vmatprep.subr.bf16.mxu1 %v699_v0  ;;  %527 = vmatprep.mubr.msk.bf16.mxu1 %vm700_vm0, %v699_v0  ;;  %v570_v6 = vld [vmem:[#allocation7 + $0x30] sm:$0xff]   ;;  %v565_v7 = vld [vmem:[#allocation5 + $0x18] sm:$0xff]   ;;  %v571_v8 = vld [vmem:[#allocation7 + $0x28] sm:$0xff]   ;;  %s426_s25 = sshll.u32 %s702_s24, 4  ;;  %s427_s25 = int_to_ptr.vmem [resolvable:$true] %s426_s25 }
  0x36   :  { %492 = vmatpush3.bf16.msra.mxu0 %v561_v1  ;;  %512 = vmatpush3.bf16.msra.mxu1 %v569_v4  ;;  %v566_v9 = vld [vmem:[#allocation5 + $0x10] sm:$0xff]   ;;  %v572_v10 = vld [vmem:[#allocation7 + $0x20] sm:$0xff]   ;;  %v567_v11 = vld [vmem:[#allocation5 + $0x8] sm:$0xff]   ;;  %p670_p7 = scmp.lt.s32.totalorder %s427_s25, %s427_s25 }
  0x37   :  { %493 = vmatprep.subr.bf16.mxu0 %v699_v0  ;;  %513 = vmatprep.subr.bf16.mxu1 %v699_v0  ;;  %v573_v12 = vld [vmem:[#allocation7 + $0x18] sm:$0xff]   ;;  %v568_v13 = vld [vmem:[#allocation5] sm:$0xff]   ;;  %v574_v14 = vld [vmem:[#allocation7 + $0x10] sm:$0xff]  }
  0x38   :  { %v81_v15 = vld [vmem:[#allocation2] sm:$0xf]  ;;  %v575_v16 = vld [vmem:[#allocation7 + $0x8] sm:$0xff]   ;;  %v576_v17 = vld [vmem:[#allocation7] sm:$0xff]  }
  0x39   :  { %v577_v18 = vld [vmem:[#allocation8 + $0x38] sm:$0xff]   ;;  %v578_v19 = vld [vmem:[#allocation8 + $0x30] sm:$0xff]   ;;  %v579_v20 = vld [vmem:[#allocation8 + $0x28] sm:$0xff]  }
  0x3a   :  { %494 = vmatpush3.bf16.msra.mxu0 %v562_v2  ;;  %514 = vmatpush3.bf16.msra.mxu1 %v570_v6  ;;  %v580_v21 = vld [vmem:[#allocation8 + $0x20] sm:$0xff]   ;;  %v581_v22 = vld [vmem:[#allocation8 + $0x18] sm:$0xff]   ;;  %v582_v23 = vld [vmem:[#allocation8 + $0x10] sm:$0xff]  }
  0x3b   :  { %495 = vmatprep.subr.bf16.mxu0 %v699_v0  ;;  %515 = vmatprep.subr.bf16.mxu1 %v699_v0  ;;  %v437_v24 = vld [vmem:[%s808_s2] ss:$0 sm:$0xff]  ;;  %v583_v33 = vld [vmem:[#allocation8 + $0x8] sm:$0xff]   ;;  %v584_v34 = vld [vmem:[#allocation8] sm:$0xff]  }
  0x3c   :  { %v446_v35 = vld [vmem:[%s810_s4] ss:$0 sm:$0xff]  ;;  %s665_s4 = scalar_lea.vmem %s427_s25, 128 }
  0x3d   :  { %v455_v43 = vld [vmem:[%s812_s6] ss:$0 sm:$0xff]  ;;  %p666_p6 = scmp.ne.s32.totalorder %s427_s25, %s665_s4  ;;  %p671_p8 = scmp.lt.s32.totalorder %s665_s4, %s665_s4 }
  0x3e   :  { %496 = vmatpush3.bf16.msra.mxu0 %v563_v3  ;;  %516 = vmatpush3.bf16.msra.mxu1 %v571_v8 }
  0x3f   :  { %497 = vmatprep.subr.bf16.mxu0 %v699_v0  ;;  %517 = vmatprep.subr.bf16.mxu1 %v699_v0  ;;  %p672_p9 = por %p671_p8, %p670_p7 }
  0x41   :  { %p673_p10 = pnand %p672_p9, %p666_p6 }
  0x42   :  { %498 = vmatpush3.bf16.msra.mxu0 %v564_v5  ;;  %518 = vmatpush3.bf16.msra.mxu1 %v572_v10 }
  0x43   :  { %499 = vmatprep.subr.bf16.mxu0 %v699_v0  ;;  %519 = vmatprep.subr.bf16.mxu1 %v699_v0 }
  0x46   :  { %500 = vmatpush3.bf16.msra.mxu0 %v565_v7  ;;  %520 = vmatpush3.bf16.msra.mxu1 %v573_v12 }
  0x47   :  { %501 = vmatprep.subr.bf16.mxu0 %v699_v0  ;;  %521 = vmatprep.subr.bf16.mxu1 %v699_v0 }
  0x4a   :  { %502 = vmatpush3.bf16.msra.mxu0 %v566_v9  ;;  %522 = vmatpush3.bf16.msra.mxu1 %v574_v14 }
  0x4b   :  { %503 = vmatprep.subr.bf16.mxu0 %v699_v0  ;;  %523 = vmatprep.subr.bf16.mxu1 %v699_v0 }
  0x4e   :  { %504 = vmatpush3.bf16.msra.mxu0 %v567_v11  ;;  %524 = vmatpush3.bf16.msra.mxu1 %v575_v16 }
  0x4f   :  { %505 = vmatprep.subr.bf16.mxu0 %v699_v0  ;;  %525 = vmatprep.subr.bf16.mxu1 %v699_v0 }
  0x52   :  { %506 = vmatpush3.bf16.msra.mxu0 %v568_v13  ;;  %526 = vmatpush3.bf16.msra.mxu1 %v576_v17 }
  0x53   :  { %531 = vmatprep.subr.bf16.mxu0 %v699_v0 }
  0x55   :  { %508 = vmatmul.mubr.bf16.vlgmr.msra.gmra.mxu0 %v81_v15 }
  0x56   :  { %547 = vmatprep.mubr.msk.bf16.mxu0 %vm700_vm0, %v699_v0  ;;  %532 = vmatpush3.bf16.msra.mxu0 %v577_v18 }
  0x57   :  { %533 = vmatprep.subr.bf16.mxu0 %v699_v0 }
  0x5a   :  { %534 = vmatpush3.bf16.msra.mxu0 %v578_v19 }
  0x5b   :  { %535 = vmatprep.subr.bf16.mxu0 %v699_v0 }
  0x5e   :  { %536 = vmatpush3.bf16.msra.mxu0 %v579_v20 }
  0x5f   :  { %537 = vmatprep.subr.bf16.mxu0 %v699_v0 }
  0x62   :  { %538 = vmatpush3.bf16.msra.mxu0 %v580_v21 }
  0x63   :  { %539 = vmatprep.subr.bf16.mxu0 %v699_v0 }
  0x66   :  { %540 = vmatpush3.bf16.msra.mxu0 %v581_v22 }
  0x67   :  { %541 = vmatprep.subr.bf16.mxu0 %v699_v0 }
  0x6a   :  { %542 = vmatpush3.bf16.msra.mxu0 %v582_v23 }
  0x6b   :  { %543 = vmatprep.subr.bf16.mxu0 %v699_v0 }
  0x6e   :  { %544 = vmatpush3.bf16.msra.mxu0 %v583_v33 }
  0x6f   :  { %545 = vmatprep.subr.bf16.mxu0 %v699_v0 }
  0x72   :  { %546 = vmatpush3.bf16.msra.mxu0 %v584_v34 }
 0x115   :  { %v187_v25 = vpop.f32.mrf.mxu0 }
 0x116   :  { %v188_v26 = vadd.f32 %v437_v24, %v187_v25 }
 0x117   :  { %v509_v27 = vpop.f32.mrf.mxu0 }
 0x118   :  { %v193_v28 = vpack.c.bf16 %v188_v26, %v188_v26 }
 0x119   :  { %v190_v29 = vpop.f32.mrf.mxu0 }
 0x11a   :  { %v194_v31 = vmax.bf16 %v701_v30, %v193_v28 }
 0x11b   :  { %v510_v32 = vpop.f32.mrf.mxu0 }
 0x11c   :  { %528 = vmatmul.mubr.bf16.vlgmr.msra.gmra.mxu1 %v194_v31 }
 0x1dc   :  { %v300_v36 = vpop.f32.mrf.mxu1 }
 0x1dd   :  { %v301_v37 = vadd.f32 %v446_v35, %v300_v36 }
 0x1de   :  { %v529_v38 = vpop.f32.mrf.mxu1 }
 0x1df   :  { %v306_v39 = vpack.c.bf16 %v301_v37, %v301_v37 }
 0x1e0   :  { %v303_v40 = vpop.f32.mrf.mxu1 }
 0x1e1   :  { %v307_v41 = vmax.bf16 %v701_v30, %v306_v39 }
 0x1e2   :  { %v530_v42 = vpop.f32.mrf.mxu1 }
 0x1e3   :  { %548 = vmatmul.mubr.bf16.vlgmr.msra.gmra.mxu0 %v307_v41 }
 0x2a3   :  { %v413_v44 = vpop.f32.mrf.mxu0 }
 0x2a4   :  { %v414_v45 = vadd.f32 %v455_v43, %v413_v44 }
 0x2a5   :  { %v549_v46 = vpop.f32.mrf.mxu0 }
 0x2a6   :  { %419 = vst [vmem:[#allocation10] sm:$0xff] %v414_v45 }
 0x2a7   :  { %v416_v47 = vpop.f32.mrf.mxu0 }
 0x2a8   :  { %676 = shalt.err (!%p673_p10)
}
 0x2a9   :  { %429 = dma.vmem_to_hbm [thread:$0]  %s427_s25, 128, %s813_s7, [#allocation4]   ;;  %v550_v48 = vpop.f32.mrf.mxu0 }
 0x2aa   :  { %691 = dma.done.wait [#allocation4], 128  }
 0x2ab   :  { %692 = vsyncadd [#allocation4], 4294967168 }
 0x2ac   :  { %433 = vsyncpa [#allocation3], 1 }
 0x2ad   :  { %434 = vsyncpa [#allocation6], 1 }
 0x2ae   :  { %435 = vsyncpa [#allocation9], 1 }
 0x2af   :  { %436 = vsyncpa [#allocation4], 1 }

</bundles_post_ra>
